<compile_context>
chip_gen: v7x
topology: tpu7x:2x2x1
jax: 0.10.0
libtpu: 0.0.40
codegen_flags: <defaults>
</compile_context>

<pallas_src>
import math
import functools

import jax
import jax.numpy as jnp
from jax.experimental import pallas as pl
from jax.experimental.pallas import tpu as pltpu

EPS = 1e-6
NEG_INF = -1e9


def _layer_norm(x, g, b, n):
    """Annotated-transformer LayerNorm: unbiased std, eps added to the std.

    Exact divide here (feeds every matmul); approx reciprocal is reserved for
    the softmax denominator only.
    """
    mean = jnp.mean(x, axis=-1, keepdims=True)
    diff = x - mean
    var = jnp.sum(diff * diff, axis=-1, keepdims=True) * (1.0 / (n - 1))
    return g * (diff / (jnp.sqrt(var) + EPS)) + b


# ----------------------------------------------------------------------------
# Kernel 1: LN0 + fused (D, 2D) K/V projection for a sequence tile.
# grid = (B, S // TS); output is the lane-dense bf16 KV slab (B, S, 2D).
# ----------------------------------------------------------------------------
def _kv_proj_kernel(x_ref, g_ref, b_ref, wkv_ref, bkv_ref, kv_ref, *, d_model):
    ln = _layer_norm(x_ref[...], g_ref[...], b_ref[...], d_model)
    kv = jnp.dot(ln.astype(jnp.bfloat16), wkv_ref[...],
                 preferred_element_type=jnp.float32) + bkv_ref[...]
    kv_ref[...] = kv.astype(jnp.bfloat16)


# ----------------------------------------------------------------------------
# Kernel 2: [LN0 -> MHA -> +res] -> [LN1 -> FFN -> +res] for one query tile.
# grid = (B, S // TQ); K/V come in as a lane-dense (S, 2D) bf16 block.
# Every grid step is independent -> both axes "parallel".
# ----------------------------------------------------------------------------
def _attn_ffn_kernel(bias_ref, x_ref, kv_ref,
                     wq_ref, bq_ref, wo_ref, bo_ref, g0_ref, beta0_ref,
                     w1_ref, b1_ref, w2_ref, b2_ref, g1_ref, beta1_ref,
                     o_ref, *, num_heads, d_model, d_k):
    scale = 1.0 / math.sqrt(d_k)

    xt = x_ref[...]                                              # (TQ, D) f32
    ln_t = _layer_norm(xt, g0_ref[...], beta0_ref[...], d_model)

    # Single full-width Q projection; heads are lane-contiguous slices of q.
    q = jnp.dot(ln_t.astype(jnp.bfloat16), wq_ref[...],
                preferred_element_type=jnp.float32) + bq_ref[...]   # (TQ, D)

    kv = kv_ref[...]                                             # (S, 2D) bf16
    bias = bias_ref[...]                                         # (1, S) f32, 0 / -1e9

    # Per-head attention core (contraction depth d_k is inherent to MHA).
    # Heads are processed sequentially so only one (TQ, S) scores tensor is live.
    ctx_heads = []
    for h in range(num_heads):
        lo, hi = h * d_k, (h + 1) * d_k
        qh = q[:, lo:hi].astype(jnp.bfloat16)                    # (TQ, dk)
        kh = kv[:, lo:hi]                                        # (S, dk)
        vh = kv[:, d_model + lo:d_model + hi]                    # (S, dk)

        s = jax.lax.dot_general(qh, kh, (((1,), (1,)), ((), ())),
                                preferred_element_type=jnp.float32)   # (TQ, S)
        s = s * scale + bias                                     # additive mask
        s = s - jnp.max(s, axis=-1, keepdims=True)               # f32 softmax
        p = jnp.exp(s)
        p = p * pl.reciprocal(jnp.sum(p, axis=-1, keepdims=True), approx=True)
        ctx_heads.append(jnp.dot(p.astype(jnp.bfloat16), vh,
                                 preferred_element_type=jnp.float32))  # (TQ, dk)

    # Heads concatenated on the lane axis -> one full-depth output projection.
    ctx = jnp.concatenate(ctx_heads, axis=-1).astype(jnp.bfloat16)     # (TQ, D)
    x1 = xt + jnp.dot(ctx, wo_ref[...],
                      preferred_element_type=jnp.float32) + bo_ref[...]

    # ---- sublayer 1: LN1 -> FFN -> residual ----
    ln1 = _layer_norm(x1, g1_ref[...], beta1_ref[...], d_model)
    hdn = jnp.dot(ln1.astype(jnp.bfloat16), w1_ref[...],
                  preferred_element_type=jnp.float32) + b1_ref[...]
    hdn = jnp.maximum(hdn, 0.0).astype(jnp.bfloat16)                   # ReLU
    ffn = jnp.dot(hdn, w2_ref[...],
                  preferred_element_type=jnp.float32) + b2_ref[...]

    # TODO(synk): dropout is treated as identity (inference mode); training-mode
    # stochastic dropout would need pltpu.prng_* inside the kernel.
    o_ref[...] = x1 + ffn


# ----------------------------------------------------------------------------
# Wrapper
# ----------------------------------------------------------------------------
def _pick_tile(s, cap):
    if s <= cap:
        return s
    for c in (256, 128, 64, 32, 16, 8):
        if c <= cap and s % c == 0:
            return c
    return s


def _vmem_budget(block_bytes, live_bytes):
    """Double-buffered pipeline blocks + in-kernel live tensors + slack,
    clamped to 75% of physical VMEM (fallback conservative for v7x)."""
    need = 2 * block_bytes + live_bytes + (2 << 20)
    try:
        cap = int(0.75 * pltpu.get_tpu_info().vmem_capacity_bytes)
    except Exception:
        cap = 48 << 20
    return int(max(min(need, cap), 4 << 20))


def encoder_layer_forward(x, mask, params, *, num_heads):
    B, S, D = x.shape
    F = params["w1"].shape[1]
    H = num_heads
    dk = D // H
    assert H * dk == D

    bf16, f32 = jnp.bfloat16, jnp.float32

    TQ = _pick_tile(S, 128)    # query-tile: cap at 128 (keeps (TQ,S) scores small)
    TS = _pick_tile(S, 256)    # sequence-tile for the KV-projection kernel
    n_qt, n_st = S // TQ, S // TS

    # Host-side weight prep: lane-dense, MXU operands in bf16.
    wq = params["wq"].astype(bf16)                                           # (D, D)
    wkv = jnp.concatenate([params["wk"], params["wv"]], axis=-1).astype(bf16)  # (D, 2D)
    bkv = jnp.concatenate([params["bk"], params["bv"]], axis=-1).astype(f32)   # (1, 2D)
    wo = params["wo"].astype(bf16)                                           # (D, D)
    w1 = params["w1"].astype(bf16)                                           # (D, F)
    w2 = params["w2"].astype(bf16)                                           # (F, D)

    # Additive mask bias (0 keep / -1e9 masked): one add instead of cmp+select.
    mask_bias = jnp.where(mask > 0, 0.0, NEG_INF).astype(f32)                # (B, 1, S)

    def const(a):
        return pl.BlockSpec(a.shape, lambda b, t, _nd=a.ndim: (0,) * _nd)

    # ---------------- kernel 1: full-sequence K/V projection -----------------
    blk1 = (TS * D * 4 + 2 * D * 4 + D * 2 * D * 2 + 2 * D * 4 + TS * 2 * D * 2)
    live1 = 4 * (3 * TS * D + TS * 2 * D)
    kv = pl.pallas_call(
        functools.partial(_kv_proj_kernel, d_model=D),
        out_shape=jax.ShapeDtypeStruct((B, S, 2 * D), bf16),
        grid=(B, n_st),
        in_specs=[pl.BlockSpec((None, TS, D), lambda b, t: (b, t, 0)),
                  const(params["ln0_g"]), const(params["ln0_b"]),
                  const(wkv), const(bkv)],
        out_specs=pl.BlockSpec((None, TS, 2 * D), lambda b, t: (b, t, 0)),
        compiler_params=pltpu.CompilerParams(
            dimension_semantics=("parallel", "parallel"),
            vmem_limit_bytes=_vmem_budget(blk1, live1)),
        cost_estimate=pl.CostEstimate(
            flops=int(B * 4 * S * D * D),
            transcendentals=int(B * S),
            bytes_accessed=int(B * S * D * 4 + B * S * 2 * D * 2 + D * 2 * D * 2)),
    )(x, params["ln0_g"], params["ln0_b"], wkv, bkv)

    # ---------------- kernel 2: attention + FFN per query tile ----------------
    blk2 = (S * 4 + TQ * D * 4 + S * 2 * D * 2            # mask, x tile, KV slab
            + 2 * D * D * 2 + 2 * D * 4                   # wq, wo, bq, bo
            + 4 * D * 4                                   # LN gammas / betas
            + D * F * 2 + F * 4 + F * D * 2 + D * 4       # w1, b1, w2, b2
            + TQ * D * 4)                                 # output tile
    live2 = 4 * (3 * TQ * S + 8 * TQ * D + 2 * TQ * F)
    flops = int(B * (4 * S * D * D + 4 * S * S * D + 4 * S * D * F))
    transcendentals = int(B * (H * S * S + 4 * S))
    bytes_accessed = int(B * (2 * S * D * 4 + S * 2 * D * 2 + S * 4)
                         + 2 * (2 * D * D + 2 * D * F))

    out = pl.pallas_call(
        functools.partial(_attn_ffn_kernel, num_heads=H, d_model=D, d_k=dk),
        out_shape=jax.ShapeDtypeStruct((B, S, D), jnp.float32),
        grid=(B, n_qt),
        in_specs=[pl.BlockSpec((None, 1, S), lambda b, t: (b, 0, 0)),       # mask bias
                  pl.BlockSpec((None, TQ, D), lambda b, t: (b, t, 0)),      # x tile
                  pl.BlockSpec((None, S, 2 * D), lambda b, t: (b, 0, 0)),   # KV slab
                  const(wq), const(params["bq"]),
                  const(wo), const(params["bo"]),
                  const(params["ln0_g"]), const(params["ln0_b"]),
                  const(w1), const(params["b1"]),
                  const(w2), const(params["b2"]),
                  const(params["ln1_g"]), const(params["ln1_b"])],
        out_specs=pl.BlockSpec((None, TQ, D), lambda b, t: (b, t, 0)),
        compiler_params=pltpu.CompilerParams(
            dimension_semantics=("parallel", "parallel"),
            vmem_limit_bytes=_vmem_budget(blk2, live2)),
        cost_estimate=pl.CostEstimate(flops=flops,
                                      transcendentals=transcendentals,
                                      bytes_accessed=bytes_accessed),
    )(mask_bias, x, kv,
      wq, params["bq"], wo, params["bo"],
      params["ln0_g"], params["ln0_b"],
      w1, params["b1"], w2, params["b2"],
      params["ln1_g"], params["ln1_b"])
    # TODO(synk): for very long S, add a key-axis (TK) tile with online softmax
    # (flash-style) to bound the (TQ,S) scores working set on v7x.
    return out


# ----------------------------------------------------------------------------
# Pure-JAX reference (mirrors the PyTorch forward exactly, f32) for validation.
# ----------------------------------------------------------------------------
def _layer_norm_ref(x, g, b):
    mean = jnp.mean(x, axis=-1, keepdims=True)
    std = jnp.sqrt(jnp.sum((x - mean) ** 2, axis=-1, keepdims=True) / (x.shape[-1] - 1))
    return g * (x - mean) / (std + EPS) + b


def encoder_layer_ref(x, mask, params, *, num_heads):
    B, S, D = x.shape
    d_k = D // num_heads
    ln = _layer_norm_ref(x, params["ln0_g"][0], params["ln0_b"][0])
    q = ln @ params["wq"] + params["bq"][0]
    k = ln @ params["wk"] + params["bk"][0]
    v = ln @ params["wv"] + params["bv"][0]
    q = q.reshape(B, S, num_heads, d_k).transpose(0, 2, 1, 3)
    k = k.reshape(B, S, num_heads, d_k).transpose(0, 2, 1, 3)
    v = v.reshape(B, S, num_heads, d_k).transpose(0, 2, 1, 3)
    scores = jnp.einsum("bhqd,bhkd->bhqk", q, k) / math.sqrt(d_k)
    m = mask[:, None, :, :]
    scores = jnp.where(m > 0, scores, -1e9)
    p = jax.nn.softmax(scores, axis=-1)
    ctx = jnp.einsum("bhqk,bhkd->bhqd", p, v).transpose(0, 2, 1, 3).reshape(B, S, D)
    x = x + ctx @ params["wo"] + params["bo"][0]
    ln = _layer_norm_ref(x, params["ln1_g"][0], params["ln1_b"][0])
    h = jnp.maximum(ln @ params["w1"] + params["b1"][0], 0.0)
    return x + h @ params["w2"] + params["b2"][0]


# ----------------------------------------------------------------------------
if __name__ == "__main__":
    B, S, D, H, F = 2, 8, 32, 4, 64     # batch, seq, d_model, heads, d_ff

    key = jax.random.PRNGKey(0)
    keys = jax.random.split(key, 16)

    def w(k, shape, scale=0.05):
        return (scale * jax.random.normal(k, shape)).astype(jnp.float32)

    params = {
        "wq": w(keys[0], (D, D)), "bq": w(keys[1], (1, D)),
        "wk": w(keys[2], (D, D)), "bk": w(keys[3], (1, D)),
        "wv": w(keys[4], (D, D)), "bv": w(keys[5], (1, D)),
        "wo": w(keys[6], (D, D)), "bo": w(keys[7], (1, D)),
        "w1": w(keys[8], (D, F)), "b1": w(keys[9], (1, F)),
        "w2": w(keys[10], (F, D)), "b2": w(keys[11], (1, D)),
        "ln0_g": jnp.ones((1, D), jnp.float32), "ln0_b": jnp.zeros((1, D), jnp.float32),
        "ln1_g": jnp.ones((1, D), jnp.float32), "ln1_b": jnp.zeros((1, D), jnp.float32),
    }

    x = jax.random.normal(keys[12], (B, S, D), dtype=jnp.float32)
    # mask: 1 = attend, 0 = masked; last positions of batch 1 masked out.
    mask = jnp.ones((B, 1, S), dtype=jnp.float32)
    mask = mask.at[1, 0, S - 2:].set(0.0)

    out = encoder_layer_forward(x, mask, params, num_heads=H)
    out = jax.block_until_ready(out)

    ref = encoder_layer_ref(x, mask, params, num_heads=H)
    assert out.shape == (B, S, D)
    # bf16 MXU operands + approx softmax reciprocal -> modest tolerance
    assert jnp.allclose(out, ref, atol=2e-2, rtol=2e-2), "mismatch vs reference"

    print("KERNEL_OK")
</pallas_src>

<mosaic_0001>
module attributes {stable_mosaic.version = 11 : i64} {
  func.func @_kv_proj_kernel(%arg0: i32, %arg1: i32, %arg2: memref<1x8x32xf32, #tpu.memory_space<vmem>>, %arg3: memref<1x32xf32, #tpu.memory_space<vmem>>, %arg4: memref<1x32xf32, #tpu.memory_space<vmem>>, %arg5: memref<32x64xbf16, #tpu.memory_space<vmem>>, %arg6: memref<1x64xf32, #tpu.memory_space<vmem>>, %arg7: memref<1x8x64xbf16, #tpu.memory_space<vmem>>) attributes {dimension_semantics = [#tpu.dimension_semantics<parallel>, #tpu.dimension_semantics<parallel>], iteration_bounds = array<i64: 2, 1>, scalar_prefetch = 0 : i64, scratch_operands = 0 : i64, tpu.core_type = #tpu.core_type<tc>, window_params = [{transform_indices = @transform_0, window_bounds = array<i64: 1, 8, 32>}, {pipeline_mode = #tpu.pipeline_mode<synchronous>, transform_indices = @transform_1, window_bounds = array<i64: 1, 32>}, {pipeline_mode = #tpu.pipeline_mode<synchronous>, transform_indices = @transform_2, window_bounds = array<i64: 1, 32>}, {pipeline_mode = #tpu.pipeline_mode<synchronous>, transform_indices = @transform_3, window_bounds = array<i64: 32, 64>}, {pipeline_mode = #tpu.pipeline_mode<synchronous>, transform_indices = @transform_4, window_bounds = array<i64: 1, 64>}, {transform_indices = @transform_5, window_bounds = array<i64: 1, 8, 64>}]} {
    %c0 = arith.constant 0 : index
    %c0_0 = arith.constant 0 : index
    %c0_1 = arith.constant 0 : index
    %0 = vector.load %arg2[%c0, %c0_0, %c0_1] : memref<1x8x32xf32, #tpu.memory_space<vmem>>, vector<1x8x32xf32>
    %1 = vector.shape_cast %0 : vector<1x8x32xf32> to vector<8x32xf32>
    %c0_2 = arith.constant 0 : index
    %c0_3 = arith.constant 0 : index
    %2 = vector.load %arg3[%c0_2, %c0_3] : memref<1x32xf32, #tpu.memory_space<vmem>>, vector<1x32xf32>
    %c0_4 = arith.constant 0 : index
    %c0_5 = arith.constant 0 : index
    %3 = vector.load %arg4[%c0_4, %c0_5] : memref<1x32xf32, #tpu.memory_space<vmem>>, vector<1x32xf32>
    %cst = arith.constant dense<0.000000e+00> : vector<8xf32>
    %4 = vector.multi_reduction <add>, %1, %cst [1] : vector<8x32xf32> to vector<8xf32>
    %5 = vector.shape_cast %4 : vector<8xf32> to vector<8x1xf32>
    %cst_6 = arith.constant 3.200000e+01 : f32
    %6 = vector.broadcast %cst_6 : f32 to vector<8x1xf32>
    %7 = arith.divf %5, %6 : vector<8x1xf32>
    %8 = vector.broadcast %7 : vector<8x1xf32> to vector<8x32xf32>
    %9 = arith.subf %1, %8 : vector<8x32xf32>
    %10 = arith.mulf %9, %9 : vector<8x32xf32>
    %cst_7 = arith.constant dense<0.000000e+00> : vector<8xf32>
    %11 = vector.multi_reduction <add>, %10, %cst_7 [1] : vector<8x32xf32> to vector<8xf32>
    %12 = vector.shape_cast %11 : vector<8xf32> to vector<8x1xf32>
    %cst_8 = arith.constant 0.0322580636 : f32
    %13 = vector.broadcast %cst_8 : f32 to vector<8x1xf32>
    %14 = arith.mulf %12, %13 : vector<8x1xf32>
    %15 = math.sqrt %14 : vector<8x1xf32>
    %cst_9 = arith.constant 9.99999997E-7 : f32
    %16 = vector.broadcast %cst_9 : f32 to vector<8x1xf32>
    %17 = arith.addf %15, %16 : vector<8x1xf32>
    %18 = vector.broadcast %17 : vector<8x1xf32> to vector<8x32xf32>
    %19 = arith.divf %9, %18 : vector<8x32xf32>
    %20 = vector.broadcast %2 : vector<1x32xf32> to vector<8x32xf32>
    %21 = arith.mulf %20, %19 : vector<8x32xf32>
    %22 = vector.broadcast %3 : vector<1x32xf32> to vector<8x32xf32>
    %23 = arith.addf %21, %22 : vector<8x32xf32>
    %24 = arith.truncf %23 : vector<8x32xf32> to vector<8x32xbf16>
    %c0_10 = arith.constant 0 : index
    %c0_11 = arith.constant 0 : index
    %25 = vector.load %arg5[%c0_10, %c0_11] : memref<32x64xbf16, #tpu.memory_space<vmem>>, vector<32x64xbf16>
    %cst_12 = arith.constant dense<0.000000e+00> : vector<8x64xf32>
    %26 = tpu.matmul %24, %25, %cst_12 {dimension_numbers = #tpu.dot_dimension_numbers<[1], [0], [0], [1], [0, 0, 1, 1], [], []>} : vector<8x32xbf16>, vector<32x64xbf16>, vector<8x64xf32> -> vector<8x64xf32>
    %c0_13 = arith.constant 0 : index
    %c0_14 = arith.constant 0 : index
    %27 = vector.load %arg6[%c0_13, %c0_14] : memref<1x64xf32, #tpu.memory_space<vmem>>, vector<1x64xf32>
    %28 = vector.broadcast %27 : vector<1x64xf32> to vector<8x64xf32>
    %29 = arith.addf %26, %28 : vector<8x64xf32>
    %30 = arith.truncf %29 : vector<8x64xf32> to vector<8x64xbf16>
    %c0_15 = arith.constant 0 : index
    %c0_16 = arith.constant 0 : index
    %c0_17 = arith.constant 0 : index
    %31 = vector.load %arg7[%c0_15, %c0_16, %c0_17] : memref<1x8x64xbf16, #tpu.memory_space<vmem>>, vector<1x8x64xbf16>
    %32 = vector.shape_cast %31 : vector<1x8x64xbf16> to vector<8x64xbf16>
    %33 = vector.shape_cast %30 : vector<8x64xbf16> to vector<1x8x64xbf16>
    tpu.vector_store %arg7[%c0_15, %c0_16, %c0_17], %33 {strides = array<i32>} : memref<1x8x64xbf16, #tpu.memory_space<vmem>>, vector<1x8x64xbf16>,
    return
  }
  func.func @transform_0(%arg0: i32, %arg1: i32) -> (i32, i32, i32) {
    %c0_i32 = arith.constant 0 : i32
    %c0_i32_0 = arith.constant 0 : i32
    return %arg0, %arg1, %c0_i32 : i32, i32, i32
  }
  func.func @transform_1(%arg0: i32, %arg1: i32) -> (i32, i32) {
    %c0_i32 = arith.constant 0 : i32
    %c0_i32_0 = arith.constant 0 : i32
    %c0_i32_1 = arith.constant 0 : i32
    return %c0_i32, %c0_i32_0 : i32, i32
  }
  func.func @transform_2(%arg0: i32, %arg1: i32) -> (i32, i32) {
    %c0_i32 = arith.constant 0 : i32
    %c0_i32_0 = arith.constant 0 : i32
    %c0_i32_1 = arith.constant 0 : i32
    return %c0_i32, %c0_i32_0 : i32, i32
  }
  func.func @transform_3(%arg0: i32, %arg1: i32) -> (i32, i32) {
    %c0_i32 = arith.constant 0 : i32
    %c0_i32_0 = arith.constant 0 : i32
    %c0_i32_1 = arith.constant 0 : i32
    return %c0_i32, %c0_i32_0 : i32, i32
  }
  func.func @transform_4(%arg0: i32, %arg1: i32) -> (i32, i32) {
    %c0_i32 = arith.constant 0 : i32
    %c0_i32_0 = arith.constant 0 : i32
    %c0_i32_1 = arith.constant 0 : i32
    return %c0_i32, %c0_i32_0 : i32, i32
  }
  func.func @transform_5(%arg0: i32, %arg1: i32) -> (i32, i32, i32) {
    %c0_i32 = arith.constant 0 : i32
    %c0_i32_0 = arith.constant 0 : i32
    return %arg0, %arg1, %c0_i32 : i32, i32, i32
  }
}

</mosaic_0001>

<bundles_post_ra>
// kernel: tpu_custom_call.1
= control target key start
LH: loop header
LB: loop body
LE: loop exit
PB: predicated region body
PF: predicated region fallthrough
CT: control target
= control target key end

     0   :  { %10 = vsyncpa [#allocation3], 0  ;;  %s1012_s0 = inlined_call_operand.hbm [shape: f32[2,8,32], index: 0, kind: input, shape index: {}]   ;;  %s1013_s1 = inlined_call_operand.vmem [shape: f32[1,32], index: 1, kind: input, shape index: {}]   ;;  %s1014_s2 = inlined_call_operand.vmem [shape: f32[1,32], index: 2, kind: input, shape index: {}]   ;;  %s1015_s3 = inlined_call_operand.hbm [shape: bf16[32,64], index: 3, kind: input, shape index: {}]   ;;  %s1016_s4 = inlined_call_operand.vmem [shape: f32[1,64], index: 4, kind: input, shape index: {}]   ;;  %s1017_s5 = inlined_call_operand.hbm [shape: bf16[2,8,64], index: 5, kind: output, shape index: {}]  }
   0x1   :  { %12 = vsyncpa [#allocation3 + $0x1], 0 }
   0x2   :  { %13 = vsyncpa [#allocation6], 0 }
   0x3   :  { %14 = vsyncpa [#allocation4], 0 }
   0x4   :  { %16 = vsyncpa [#allocation4 + $0x1], 0  ;;  %s785_s18 = smov 0   ;;  %s787_s19 = smov 0  }
   0x5   :  { %s789_s20 = smov 0   ;;  %s791_s21 = smov 0  }
   0x6   :  { %s793_s22 = smov 0   ;;  %s795_s23 = smov 0  }
   0x7 LB: > { %s487_s24 = sadd.s32 4294967295, %s746_s23   ;;  %s488_s25 = sadd.s32 4294967294, %s746_s23   ;;  %s746_s23 = sphi %s795_s23, %s22_s23   ;;  %s742_s22 = sphi %s793_s22, %s1041_s22   ;;  %s738_s21 = sphi %s791_s21, %s1040_s21   ;;  %s734_s20 = sphi %s789_s20, %s1039_s20   ;;  %s730_s19 = sphi %s787_s19, %s1038_s19   ;;  %s726_s18 = sphi %s785_s18, %s1037_s18  }
   0x8   : > { %p56_p0 = scmp.ne.s32.totalorder %s730_s19, %s726_s18  ;;  %p819_p1 = scmp.eq.s32.totalorder %s487_s24, 0 }
   0x9   : > { %p823_p2 = scmp.eq.s32.totalorder %s487_s24, 1  ;;  %p172_p3 = scmp.eq.s32.totalorder %s488_s25, 1 }
   0xa   : > { %s1022_s26 = scalar_select %p819_p1, 1, 0 }
   0xb   : > { %s1023_s27 = scalar_select %p823_p2, 1, 0 }
   0xc   : > { %p829_p4 = por %p819_p1, %p56_p0  ;;  %p489_p5 = scmp.ge.s32.totalorder %s746_s23, 1 }
   0xd   : > { %p834_p6 = por %p172_p3, %p56_p0  ;;  %p179_p7 = scmp.lt.s32.totalorder %s746_s23, 3 }
   0xe   : > { %s1024_s28 = scalar_select %p829_p4, 1, 0 }
   0xf   : > { %s1025_s29 = scalar_select %p834_p6, 1, 0 }
  0x10   : > { %p839_p8 = pnand %p489_p5, %p179_p7  ;;  %s748_s6 = smov [#allocation5]  }
  0x11   : > { %s197_s7 = sshll.u32 %s748_s6, 4  ;;  %s34_s9 = sadd.s32 1, %s742_s22  ;;  %s198_s7 = int_to_ptr.vmem [resolvable:$true] %s197_s7 }
  0x12   : > { %s1026_s30 = scalar_select %p839_p8, 1, 0 }
  0x13   : > { %p527_p9 = pneg %p839_p8  ;;  %s602_s12 = scalar_lea.hbm %s1015_s3, 256 }
  0x14   : > { %p603_p12 = scmp.ne.s32.totalorder %s1015_s3, %s602_s12  ;;  %p609_p5 = scmp.lt.u32.totalorder %s602_s12, %s1015_s3 }
  0x15   : > { %p848_p11 = pnand %p527_p9, %p819_p1 }
  0x17   : > { %p604_p13 = pneg %p848_p11 }
  0x19   : > { %p605_p0 = pnand %p604_p13, %p603_p12 }
  0x1b   : > { %p606_p3 = pneg %p605_p0 }
  0x1d   : > { %p611_p7 = pnand %p609_p5, %p606_p3 }
  0x1f   : > { %614 = shalt.err (!%p611_p7)
}
  0x20   : > { %s615_s17 = scalar_lea.vmem %s198_s7, 256  ;;  %p623_p1 = scmp.lt.s32.totalorder %s198_s7, %s198_s7 }
  0x21   : > { %p616_p9 = scmp.ne.s32.totalorder %s198_s7, %s615_s17  ;;  %p624_p4 = scmp.lt.s32.totalorder %s615_s17, %s615_s17 }
  0x23   : > { %p618_p10 = pnand %p616_p9, %p604_p13  ;;  %p625_p8 = por %p624_p4, %p623_p1 }
  0x25   : > { %p619_p6 = pneg %p618_p10 }
  0x27   : > { %p626_p2 = pnand %p625_p8, %p619_p6 }
  0x29   : > { %629 = shalt.err (!%p626_p2)
}
  0x2a   : > { %s749_s24 = smov 64   ;;  %s750_s25 = smov 4  }
  0x2b   : > { %530 = dma.hbm_to_vmem [thread:$0]  (!%p848_p11), %s1015_s3, 256, %s198_s7, [#allocation6], %s749_s24, %s749_s24, %s750_s25  }
  0x2c   : > { %p36_p1 = scmp.ge.s32.totalorder %s34_s9, 2  ;;  %s43_s11 = sadd.s32 1, %s734_s20 }
  0x2d   : > { %p50_p2 = scmp.ne.s32.totalorder %s734_s20, %s730_s19  ;;  %p51_p4 = scmp.eq.s32.totalorder %s746_s23, 0 }
  0x2e   : > { %s1043_s9 = smov (%p36_p1, %s34_s9), 0  ;;  %p1029_p8 = scmp.ne.s32.totalorder %s1023_s27, 0 }
  0x2f   : > { %p875_p6 = por %p51_p4, %p50_p2  ;;  %s38_s8 = ssub.s32 %s742_s22, %s1043_s9 }
  0x30   : > { %p881_p10 = por %p1029_p8, %p50_p2  ;;  %p540_p12 = scmp.lt.s32.totalorder %s746_s23, 2 }
  0x31   : > { %p41_p11 = scmp.eq.s32.totalorder %s38_s8, 0  ;;  %s214_s7 = sand.u32 1, %s734_s20  }
  0x32   : > { %s492_s14 = sshll.u32 %s214_s7, 3  ;;  %s493_s16 = sshll.u32 %s742_s22, 7 }
  0x33   : > { %s890_s15 = scalar_select %p41_p11, %s734_s20, %s43_s11  }
  0x34   : > { %s896_s25 = scalar_lea.hbm %s1012_s0, %s493_s16  ;;  %s218_s27 = scalar_lea.vmem [#allocation2], %s492_s14 }
  0x35   : > { %s226_s6 = sshll.u32 %s218_s27, 4  ;;  %p902_p13 = pnand %p540_p12, %p875_p6  ;;  %s898_s6 = int_to_ptr.vmem [resolvable:$true] %s226_s6 }
  0x36   : > { %s215_s11 = scalar_lea.sflag [#allocation3], %s214_s7  ;;  %s630_s8 = scalar_lea.hbm %s896_s25, 128 }
  0x37   : > { %p631_p0 = scmp.ne.s32.totalorder %s896_s25, %s630_s8  ;;  %p632_p3 = pneg %p902_p13 }
  0x38   : > { %s635_s17 = scalar_lea.hbm %s1012_s0, 256  ;;  %p636_p9 = scmp.lt.u32.totalorder %s896_s25, %s1012_s0 }
  0x39   : > { %p633_p5 = pnand %p632_p3, %p631_p0  ;;  %p637_p1 = scmp.lt.u32.totalorder %s635_s17, %s630_s8 }
  0x3a   : > { %p639_p4 = scmp.lt.u32.totalorder %s630_s8, %s896_s25 }
  0x3b   : > { %p634_p7 = pneg %p633_p5  ;;  %p638_p2 = por %p637_p1, %p636_p9 }
  0x3d   : > { %p640_p6 = por %p639_p4, %p638_p2 }
  0x3f   : > { %p641_p8 = pnand %p640_p6, %p634_p7 }
  0x41   : > { %644 = shalt.err (!%p641_p8)
}
  0x42   : > { %s645_s7 = scalar_lea.vmem %s898_s6, 128  ;;  %s751_s27 = smov [#allocation2]  }
  0x43   : > { %p646_p12 = scmp.ne.s32.totalorder %s898_s6, %s645_s7  ;;  %s650_s14 = sshll.u32 %s751_s27, 4  ;;  %s651_s14 = int_to_ptr.vmem [resolvable:$false] %s650_s14 }
  0x44   : > { %s652_s16 = scalar_lea.vmem %s651_s14, 256  ;;  %p653_p5 = scmp.lt.s32.totalorder %s898_s6, %s651_s14 }
  0x45   : > { %p648_p11 = pnand %p646_p12, %p632_p3  ;;  %p654_p9 = scmp.lt.s32.totalorder %s652_s16, %s645_s7 }
  0x47   : > { %p649_p0 = pneg %p648_p11  ;;  %p655_p1 = por %p654_p9, %p653_p5 }
  0x49   : > { %p656_p2 = pnand %p655_p1, %p649_p0 }
  0x4b   : > { %659 = shalt.err (!%p656_p2)
}
  0x4c   : > { %534 = dma.hbm_to_vmem [thread:$0]  (!%p902_p13), %s896_s25, 128, %s898_s6, %s215_s11  }
  0x4d   : > { %p1032_p7 = scmp.ne.s32.totalorder %s1026_s30, 0 }
  0x4e   : > { %s934_s8 = sand.u32 (!%p1032_p7), 1, %s730_s19   ;;  %p1033_p3 = scmp.ne.s32.totalorder (!%p1032_p7), %s1024_s28, 0 }
  0x4f   : > { %235 = sbr.rel (%p1032_p7) target bundleno = 651 (0x28b), region = 40  ;;  %s495_s17 = sshll.u32 (!%p1032_p7), %s934_s8, 3 }
  0x50   : > { %s238_s12 = scalar_lea.sflag (!%p1032_p7), [#allocation3], %s934_s8  ;;  %s241_s24 = scalar_lea.vmem (!%p1032_p7), [#allocation2], %s495_s17 }
  0x56   : > { %713 = dma.done.wait (%p1033_p3), %s238_s12, 128  }
  0x57   : > { %715 = vsyncadd (%p1033_p3), %s238_s12, 4294967168  ;;  %p1034_p4 = scmp.ne.s32.totalorder %s1022_s26, 0 }
  0x59   : > { %717 = dma.done.wait (%p1034_p4), [#allocation6], 256  }
  0x5a   : > { %719 = vsyncadd (%p1034_p4), [#allocation6], 4294967040  ;;  %vm276_vm0 = vcmask 261120   ;;  %v273_v0 = vld [vmem:[%s241_s24] sm:$0xff]  ;;  %v596_v7 = vld [vmem:[#allocation5] sm:$0xff]   ;;  %v752_v8 = vmov 0.0  }
  0x5b   : > { %v277_v1 = vsel %vm276_vm0, %v273_v0, 0.0  ;;  %511 = vmatprep.subr.bf16.mxu0 %v752_v8  ;;  %vm753_vm1 = vmmov 0   ;;  %v597_v9 = vld [vmem:[#allocation5 + $0x8] sm:$0xff]   ;;  %v498_v19 = vld [vmem:[%s1013_s1] ss:$0 sm:$0xff]  ;;  %s497_s6 = sshll.u32 %s934_s8, 2 }
  0x5c   : > { %278 = vadd.xlane.f32.xlu0 %v277_v1  ;;  %515 = vmatprep.mubr.msk.bf16.mxu0 %vm753_vm1, %v752_v8  ;;  %v499_v21 = vld [vmem:[%s1014_s2] ss:$0 sm:$0xff]  ;;  %s505_s7 = sshll.u32 %s738_s21, 6  ;;  %s271_s27 = scalar_lea.vmem [#allocation7], %s497_s6  ;;  %vm380_vm4 = vcmask 519168  }
  0x5d   : > { %512 = vmatpush3.bf16.msra.mxu0 %v596_v7  ;;  %v500_v25 = vld [vmem:[%s1016_s4] ss:$0 sm:$0xff]  ;;  %s397_s14 = sshll.u32 %s271_s27, 4  ;;  %s963_s12 = scalar_lea.hbm %s1017_s5, %s505_s7  ;;  %s965_s14 = int_to_ptr.vmem [resolvable:$true] %s397_s14 }
  0x5e   : > { %513 = vmatprep.subr.bf16.mxu0 %v752_v8  ;;  %s383_s21 = scalar_lea.sflag [#allocation4], %s934_s8  ;;  %s660_s24 = scalar_lea.vmem %s965_s14, 64 }
  0x5f   : > { %p661_p13 = scmp.ne.s32.totalorder %s965_s14, %s660_s24  ;;  %s754_s26 = smov [#allocation7]  }
  0x60   : > { %s664_s28 = sshll.u32 %s754_s26, 4  ;;  %s665_s28 = int_to_ptr.vmem [resolvable:$false] %s664_s28 }
  0x61   : > { %514 = vmatpush3.bf16.msra.mxu0 %v597_v9  ;;  %p662_p6 = pnand %p661_p13, %p881_p10  ;;  %s666_s30 = scalar_lea.vmem %s665_s28, 128 }
  0x62   : > { %p667_p12 = scmp.lt.s32.totalorder %s965_s14, %s665_s28  ;;  %p668_p11 = scmp.lt.s32.totalorder %s666_s30, %s660_s24 }
  0x63   : > { %p663_p8 = pneg %p662_p6 }
  0x64   : > { %p669_p0 = por %p668_p11, %p667_p12 }
  0x66   : > { %p670_p5 = pnand %p669_p0, %p663_p8 }
  0xe9   : > { %v279_v2 = vpop.xlane.xlu0 %278 }
  0xea   : > { %v281_v3 = vmul.f32 0.03125, %v279_v2 }
  0xec   : > { %v282_v4 = vsub.f32 %v273_v0, %v281_v3 }
  0xee   : > { %v283_v5 = vmul.f32 %v282_v4, %v282_v4 }
  0xf0   : > { %v284_v6 = vsel %vm276_vm0, %v283_v5, 0.0 }
  0xf1   : > { %285 = vadd.xlane.f32.xlu0 %v284_v6 }
 0x17e   : > { %v286_v10 = vpop.xlane.xlu0 %285 }
 0x17f   : > { %v287_v11 = vmul.f32 0.032258064, %v286_v10 }
 0x181   : > { %598 = vrsqrt.f32 %v287_v11  ;;  %vm290_vm2 = vcmp.eq.f32.partialorder %v287_v11, inf  ;;  %v293_v14 = vand.u32 2147483648, %v287_v11  ;;  %vm292_vm3 = vcmp.eq.f32.partialorder %v287_v11, 0.0 }
 0x18b   : > { %v599_v12 = vpop.eup %598 }
 0x18c   : > { %v289_v13 = vmul.f32 %v599_v12, %v287_v11 }
 0x18e   : > { %v291_v15 = vsel %vm290_vm2, %v287_v11, %v289_v13 }
 0x18f   : > { %v294_v16 = vsel %vm292_vm3, %v293_v14, %v291_v15 }
 0x190   : > { %v295_v17 = vadd.f32 1e-06, %v294_v16 }
 0x192   : > { %600 = vrcp.f32 %v295_v17 }
 0x19c   : > { %v601_v18 = vpop.eup %600 }
 0x19d   : > { %v297_v20 = vmul.f32 %v601_v18, %v282_v4 }
 0x19f   : > { %v304_v22 = vmul.f32 %v498_v19, %v297_v20 }
 0x1a1   : > { %v311_v23 = vadd.f32 %v499_v21, %v304_v22 }
 0x1a3   : > { %v312_v24 = vpack.c.bf16 %v311_v23, %v311_v23 }
 0x1a5   : > { %516 = vmatmul.mubr.msk.bf16.vlgmr.msra.gmra.mrb[0].mxu0 %vm276_vm0, %v312_v24 }
 0x278   : > { %v373_v26 = vpop.f32.mrb[0].mxu0 }
 0x279   : > { %v374_v27 = vadd.f32 %v500_v25, %v373_v26  ;;  %v517_v28 = vpop.f32.mrb[1].mxu0 }
 0x27a   : > { %v376_v29 = vpop.f32.mrb[2].mxu0 }
 0x27b   : > { %v379_v30 = vpack.c.bf16 %v374_v27, %v374_v27  ;;  %v518_v31 = vpop.f32.mrb[3].mxu0 }
 0x27d   : > { %381 = vst.msk [vmem:[%s271_s27] sm:$0xf] %vm380_vm4, %v379_v30 }
 0x27e   : > { %673 = shalt.err (!%p670_p5)
}
 0x27f   : > { %s674_s8 = scalar_lea.hbm %s963_s12, 64  ;;  %s678_s10 = scalar_lea.hbm %s1017_s5, 128 }
 0x280   : > { %p675_p9 = scmp.ne.s32.totalorder %s963_s12, %s674_s8  ;;  %p679_p7 = scmp.lt.u32.totalorder %s963_s12, %s1017_s5 }
 0x281   : > { %p680_p3 = scmp.lt.u32.totalorder %s678_s10, %s674_s8  ;;  %p682_p13 = scmp.lt.u32.totalorder %s674_s8, %s963_s12 }
 0x282   : > { %p676_p1 = pnand %p675_p9, %p881_p10 }
 0x283   : > { %p681_p4 = por %p680_p3, %p679_p7 }
 0x284   : > { %p677_p2 = pneg %p676_p1 }
 0x285   : > { %p683_p6 = por %p682_p13, %p681_p4 }
 0x287   : > { %p684_p8 = pnand %p683_p6, %p677_p2 }
 0x289   : > { %687 = shalt.err (!%p684_p8)
}
 0x28a   : > { %525 = dma.vmem_to_hbm [thread:$0]  (%p881_p10), %s965_s14, 64, %s963_s12, %s383_s21  }
 0x28b PF: > { %s409_s27 = sand.u32 1, %s726_s18   ;;  %p1035_p12 = scmp.ne.s32.totalorder %s1025_s29, 0 }
 0x28c   : > { %p1036_p11 = scmp.ge.s32.totalorder %s746_s23, 2  ;;  %s410_s16 = scalar_lea.sflag [#allocation4], %s409_s27 }
 0x28e   : > { %p536_p0 = pnand %p1036_p11, %p1035_p12 }
 0x290   : > { %721 = dma.done.wait (!%p536_p0), %s410_s16, 64  }
 0x291   : > { %723 = vsyncadd (!%p536_p0), %s410_s16, 4294967232  ;;  %s22_s23 = sadd.s32 1, %s746_s23   ;;  %s1037_s18 = smov %s730_s19 }
 0x292   : > { %p19_p5 = scmp.ge.s32.totalorder %s22_s23, 4   ;;  %s1038_s19 = smov %s734_s20 }
 0x293   : > { %s1039_s20 = smov %s890_s15  ;;  %s1040_s21 = smov %s742_s22 }
 0x294   : > { %s1041_s22 = smov %s1043_s9  ;;  %21 = sbr.rel (!%p19_p5) target bundleno = 7 (0x7), region = 89 }
 0x29b   :  { %415 = vsyncpa [#allocation3], 1 }
 0x29c   :  { %417 = vsyncpa [#allocation3 + $0x1], 1 }
 0x29d   :  { %418 = vsyncpa [#allocation6], 1 }
 0x29e   :  { %419 = vsyncpa [#allocation4], 1 }
 0x29f   :  { %421 = vsyncpa [#allocation4 + $0x1], 1 }

</bundles_post_ra>
